<compile_context>
chip_gen: v7x
topology: tpu7x:2x2x1
jax: 0.10.0
libtpu: 0.0.40
codegen_flags: <defaults>
</compile_context>

<pallas_src>
import functools

import jax
import jax.numpy as jnp
import numpy as np
from jax.experimental import pallas as pl
from jax.experimental.pallas import tpu as pltpu


_PAD_X = -1.0e4   # exp(-1e4) -> 0 in f32, so padded elements add exactly 0 loss
_PAD_T = -1       # never matches a class id in [0, C) -> one-hot row of zeros


def _cdiv(a, b):
    return -(-a // b)


def _round_up(a, b):
    return _cdiv(a, b) * b


def _bce_galoss_kernel(x_ref, t_ref, rep_ref, invg_ref, out_ref, *,
                       mask_tail, valid_rows):
    """One grid step: lane-dense partial sum of BCE + gamma-agreement loss.

    x_ref   : (TR, 128)   float  folded inputs (k = 128//cp samples per row)
    t_ref   : (TR, k+1)   bf16   folded targets + trailing ones column
    rep_ref : (k+1, 128)  bf16   loop-invariant [replication ; -(lane % cp)]
    invg_ref: (1, 1)      f32    1 / gamma2 (SMEM scalar)
    out_ref : (1, 8, 128) f32    this tile's partial sum (row 0 is the result)
    """
    x = x_ref[...].astype(jnp.float32)                    # (TR, 128)
    tr = x.shape[0]

    # One bf16 MXU matmul gives  t[r, l // cp] - (l % cp)  exactly (small ints);
    # the one-hot mask is simply "== 0".  MXU is otherwise idle here.
    diff = jnp.dot(t_ref[...], rep_ref[...],
                   preferred_element_type=jnp.float32)    # (TR, 128)
    y = diff == 0.0

    if mask_tail:
        # Last grid tile is partial: rows past the array hold stale VMEM.
        # Mask x BEFORE exp/log (no NaN/Inf) and kill any spurious one-hots.
        rem = valid_rows - pl.program_id(0) * tr
        row_id = jax.lax.broadcasted_iota(jnp.int32, x.shape, 0)
        row_ok = row_id < rem
        x = jnp.where(row_ok, x, _PAD_X)
        y = jnp.logical_and(y, row_ok)

    inv_g2 = invg_ref[0, 0]
    # log p = log(exp(x)) = x  (clamped at -100, matching torch BCELoss).
    log_p = jnp.maximum(x, -100.0)
    log_1mp = jnp.maximum(jnp.log(1.0 - jnp.exp(x)), -100.0)   # EUP-bound pair
    # bce + Y*(-x)/g2  ==  -( log_1mp + Y*(log_p - log_1mp + x/g2) )
    contrib = log_1mp + jnp.where(y, log_p - log_1mp + x * inv_g2, 0.0)

    # Sublane-wise (axis-0) reduction only: vreg adds, no 128-lane XLU reduce.
    col = jnp.sum(contrib, axis=0, keepdims=True)          # (1, 128)
    out_ref[...] = jnp.broadcast_to(-col, (1, 8, 128))


def bce_galoss(inputs, targets, gamma2, *, tile_rows=2048):
    """Forward pass of BCE_GALoss.

    inputs : (N, C) float array (log-probabilities = -distances; expected <= 0)
    targets: (N,)   int array of class ids in [0, C)
    gamma2 : scalar
    """
    n, c = inputs.shape
    if c > 128:
        # TODO(synk): support C > 128 (one sample spanning multiple 128-lane rows).
        raise NotImplementedError("bce_galoss kernel currently supports C <= 128")

    if not jnp.issubdtype(inputs.dtype, jnp.floating):
        inputs = inputs.astype(jnp.float32)
    # NOTE: bf16 inputs stay bf16 through HBM / the BlockSpec (halves traffic);
    # the f32 promotion happens inside the kernel right before exp/log.

    # Pad classes up to a power of two dividing 128 so k = 128//cp samples fold
    # into one 128-lane row.  Runtime/bandwidth scale with cp/c inflation.
    cp = 1 << (c - 1).bit_length() if c > 1 else 1
    k = 128 // cp
    rows_needed = _cdiv(n, k)

    x = inputs
    t = targets.astype(jnp.int32)

    # Single merged pad (class pad + minimal row pad, rows rounded to a
    # multiple of 8) -- ONE HBM copy instead of two; skipped when aligned.
    # Tile-boundary padding is never materialized: partial final tiles are
    # masked in-kernel instead.
    need_pad = (cp != c) or (n % k != 0) or (rows_needed % 8 != 0)
    if need_pad:
        rows_arr = max(_round_up(rows_needed, 8), 8)
        n_pad = rows_arr * k
        x = jnp.pad(x, ((0, n_pad - n), (0, cp - c)), constant_values=_PAD_X)
        t = jnp.pad(t, ((0, n_pad - n),), constant_values=_PAD_T)
    else:
        rows_arr = rows_needed

    x_fold = x.reshape(rows_arr, 128)                       # free row-major view
    # Folded targets + trailing ones column (bf16 is exact for ids < 256, -1).
    t_aug = jnp.concatenate(
        [t.reshape(rows_arr, k).astype(jnp.bfloat16),
         jnp.ones((rows_arr, 1), jnp.bfloat16)], axis=1)    # (rows, k+1)

    # Loop-invariant replication / one-hot matrix (compile-time constant):
    #   rep_aug[j, l] = (l // cp == j) for j < k ;  rep_aug[k, l] = -(l % cp)
    lane = np.arange(128)
    rep = (lane[None, :] // cp == np.arange(k)[:, None]).astype(np.float32)
    rep_aug = jnp.asarray(
        np.concatenate([rep, -(lane % cp)[None, :].astype(np.float32)], axis=0),
        dtype=jnp.bfloat16)                                 # (k+1, 128)

    inv_g2 = (1.0 / jnp.asarray(gamma2, jnp.float32)).reshape(1, 1)

    # Tiling: multiple-of-8 row tiles; >= 2 tiles whenever rows permit so both
    # v7x TensorCores get work (harmless on v5e/v6e); partial final tile is
    # masked in-kernel rather than padded.
    num_tiles = _cdiv(rows_arr, tile_rows)
    if num_tiles == 1 and rows_arr >= 16:
        num_tiles = 2
    tr = _round_up(_cdiv(rows_arr, num_tiles), 8)
    grid = _cdiv(rows_arr, tr)
    mask_tail = (rows_arr % tr) != 0

    kernel = functools.partial(_bce_galoss_kernel,
                               mask_tail=mask_tail, valid_rows=rows_arr)

    partials = pl.pallas_call(
        kernel,
        out_shape=jax.ShapeDtypeStruct((grid, 8, 128), jnp.float32),
        grid=(grid,),
        in_specs=[
            pl.BlockSpec((tr, 128), lambda i: (i, 0)),          # folded inputs tile
            pl.BlockSpec((tr, k + 1), lambda i: (i, 0)),        # folded targets tile
            pl.BlockSpec((k + 1, 128), lambda i: (0, 0)),       # loop-invariant rep
            pl.BlockSpec(memory_space=pltpu.MemorySpace.SMEM),  # 1/gamma2 scalar
        ],
        out_specs=pl.BlockSpec((1, 8, 128), lambda i: (i, 0, 0)),
        compiler_params=pltpu.CompilerParams(
            # Independent per-tile partial sums: v7x can split the grid across
            # its two TensorCores; single-TC chips just loop.
            dimension_semantics=("parallel",),
            # NOTE(v5e): add pipeline_mode=pl.Buffered(3) on in_specs[0] if a
            # trace shows exposed DMA there (HBM ~0.82 TB/s); not needed on
            # v6e/v7x where the kernel is EUP-bound.
        ),
    )(x_fold, t_aug, rep_aug, inv_g2)

    # Tiny final cross-lane reduce + scalar normalization (true N*C mean).
    return jnp.sum(partials[:, 0, :]) / (n * c)


def _reference(inputs, targets, gamma2):
    c = inputs.shape[1]
    x = inputs.astype(jnp.float32)
    y = jnp.eye(c, dtype=jnp.float32)[targets]
    p = jnp.exp(x)
    log_p = jnp.maximum(jnp.log(p), -100.0)
    log_1mp = jnp.maximum(jnp.log(1.0 - p), -100.0)
    bce = jnp.mean(-(y * log_p + (1.0 - y) * log_1mp))
    ga = jnp.mean(y * (-x) / gamma2)
    return bce + ga


if __name__ == "__main__":
    key = jax.random.PRNGKey(0)
    k1, k2, k3, k4, k5, k6 = jax.random.split(key, 6)

    # Case 1: the module's natural small shapes (batch N=8, c=16 classes).
    # inputs must be <= 0 so exp(inputs) is a valid probability for BCE.
    n, c = 8, 16
    inputs = -jnp.abs(jax.random.normal(k1, (n, c), dtype=jnp.float32)) - 1e-3
    targets = jax.random.randint(k2, (n,), 0, c, dtype=jnp.int32)
    gamma2 = 2.0
    loss = jax.block_until_ready(bce_galoss(inputs, targets, gamma2))
    ref = _reference(inputs, targets, gamma2)
    assert jnp.allclose(loss, ref, rtol=1e-4, atol=1e-5), (loss, ref)

    # Case 2: exercises the single merged class+row pad (C not a power of two).
    n2, c2 = 37, 10
    inputs2 = -jnp.abs(jax.random.normal(k3, (n2, c2), dtype=jnp.float32)) - 1e-3
    targets2 = jax.random.randint(k4, (n2,), 0, c2, dtype=jnp.int32)
    loss2 = jax.block_until_ready(bce_galoss(inputs2, targets2, 3.5))
    ref2 = _reference(inputs2, targets2, 3.5)
    assert jnp.allclose(loss2, ref2, rtol=1e-4, atol=1e-5), (loss2, ref2)

    # Case 3: no wrapper pad at all, 2 grid tiles, partial (masked) final tile.
    n3, c3 = 192, 16
    inputs3 = -jnp.abs(jax.random.normal(k5, (n3, c3), dtype=jnp.float32)) - 1e-3
    targets3 = jax.random.randint(k6, (n3,), 0, c3, dtype=jnp.int32)
    loss3 = jax.block_until_ready(bce_galoss(inputs3, targets3, 1.7))
    ref3 = _reference(inputs3, targets3, 1.7)
    assert jnp.allclose(loss3, ref3, rtol=1e-4, atol=1e-5), (loss3, ref3)

    print("KERNEL_OK")
</pallas_src>

<mosaic_0001>
module attributes {stable_mosaic.version = 11 : i64} {
  func.func @_bce_galoss_kernel(%arg0: i32, %arg1: memref<8x128xf32, #tpu.memory_space<vmem>>, %arg2: memref<8x9xbf16, #tpu.memory_space<vmem>>, %arg3: memref<9x128xbf16, #tpu.memory_space<vmem>>, %arg4: memref<1x1xf32, #tpu.memory_space<smem>>, %arg5: memref<1x8x128xf32, #tpu.memory_space<vmem>>) attributes {dimension_semantics = [#tpu.dimension_semantics<parallel>], iteration_bounds = array<i64: 1>, scalar_prefetch = 0 : i64, scratch_operands = 0 : i64, tpu.core_type = #tpu.core_type<tc>, window_params = [{transform_indices = @transform_0, window_bounds = array<i64: 8, 128>}, {transform_indices = @transform_1, window_bounds = array<i64: 8, 9>}, {pipeline_mode = #tpu.pipeline_mode<synchronous>, transform_indices = @transform_2, window_bounds = array<i64: 9, 128>}, {transform_indices = @transform_3, window_bounds = array<i64: 1, 1>}, {transform_indices = @transform_4, window_bounds = array<i64: 1, 8, 128>}]} {
    %c0 = arith.constant 0 : index
    %c0_0 = arith.constant 0 : index
    %0 = vector.load %arg1[%c0, %c0_0] : memref<8x128xf32, #tpu.memory_space<vmem>>, vector<8x128xf32>
    %c0_1 = arith.constant 0 : index
    %c0_2 = arith.constant 0 : index
    %1 = vector.load %arg2[%c0_1, %c0_2] : memref<8x9xbf16, #tpu.memory_space<vmem>>, vector<8x9xbf16>
    %c0_3 = arith.constant 0 : index
    %c0_4 = arith.constant 0 : index
    %2 = vector.load %arg3[%c0_3, %c0_4] : memref<9x128xbf16, #tpu.memory_space<vmem>>, vector<9x128xbf16>
    %cst = arith.constant dense<0.000000e+00> : vector<8x128xf32>
    %3 = tpu.matmul %1, %2, %cst {dimension_numbers = #tpu.dot_dimension_numbers<[1], [0], [0], [1], [0, 0, 1, 1], [], []>} : vector<8x9xbf16>, vector<9x128xbf16>, vector<8x128xf32> -> vector<8x128xf32>
    %cst_5 = arith.constant 0.000000e+00 : f32
    %4 = vector.broadcast %cst_5 : f32 to vector<8x128xf32>
    %5 = arith.cmpf oeq, %3, %4 : vector<8x128xf32>
    %c0_6 = arith.constant 0 : index
    %c0_7 = arith.constant 0 : index
    %6 = memref.load %arg4[%c0_6, %c0_7] : memref<1x1xf32, #tpu.memory_space<smem>>
    %cst_8 = arith.constant -1.000000e+02 : f32
    %7 = vector.broadcast %cst_8 : f32 to vector<8x128xf32>
    %8 = arith.maximumf %0, %7 : vector<8x128xf32>
    %9 = math.exp %0 : vector<8x128xf32>
    %cst_9 = arith.constant 1.000000e+00 : f32
    %10 = vector.broadcast %cst_9 : f32 to vector<8x128xf32>
    %11 = arith.subf %10, %9 : vector<8x128xf32>
    %12 = math.log %11 : vector<8x128xf32>
    %cst_10 = arith.constant -1.000000e+02 : f32
    %13 = vector.broadcast %cst_10 : f32 to vector<8x128xf32>
    %14 = arith.maximumf %12, %13 : vector<8x128xf32>
    %15 = arith.subf %8, %14 : vector<8x128xf32>
    %16 = vector.broadcast %6 : f32 to vector<8x128xf32>
    %17 = arith.mulf %0, %16 : vector<8x128xf32>
    %18 = arith.addf %15, %17 : vector<8x128xf32>
    %cst_11 = arith.constant 0.000000e+00 : f32
    %19 = vector.broadcast %cst_11 : f32 to vector<8x128xf32>
    %20 = arith.select %5, %18, %19 : vector<8x128xi1>, vector<8x128xf32>
    %21 = arith.addf %14, %20 : vector<8x128xf32>
    %cst_12 = arith.constant dense<0.000000e+00> : vector<128xf32>
    %22 = vector.multi_reduction <add>, %21, %cst_12 [0] : vector<8x128xf32> to vector<128xf32>
    %23 = vector.shape_cast %22 : vector<128xf32> to vector<1x128xf32>
    %cst_13 = arith.constant 0.000000e+00 : f32
    %24 = vector.broadcast %cst_13 : f32 to vector<1x128xf32>
    %25 = arith.subf %24, %23 : vector<1x128xf32>
    %26 = vector.shape_cast %25 : vector<1x128xf32> to vector<1x1x128xf32>
    %27 = vector.broadcast %26 : vector<1x1x128xf32> to vector<1x8x128xf32>
    %c0_14 = arith.constant 0 : index
    %c0_15 = arith.constant 0 : index
    %c0_16 = arith.constant 0 : index
    %28 = vector.load %arg5[%c0_14, %c0_15, %c0_16] : memref<1x8x128xf32, #tpu.memory_space<vmem>>, vector<1x8x128xf32>
    tpu.vector_store %arg5[%c0_14, %c0_15, %c0_16], %27 {strides = array<i32>} : memref<1x8x128xf32, #tpu.memory_space<vmem>>, vector<1x8x128xf32>,
    return
  }
  func.func @transform_0(%arg0: i32) -> (i32, i32) {
    %c0_i32 = arith.constant 0 : i32
    %c0_i32_0 = arith.constant 0 : i32
    return %arg0, %c0_i32 : i32, i32
  }
  func.func @transform_1(%arg0: i32) -> (i32, i32) {
    %c0_i32 = arith.constant 0 : i32
    %c0_i32_0 = arith.constant 0 : i32
    return %arg0, %c0_i32 : i32, i32
  }
  func.func @transform_2(%arg0: i32) -> (i32, i32) {
    %c0_i32 = arith.constant 0 : i32
    %c0_i32_0 = arith.constant 0 : i32
    %c0_i32_1 = arith.constant 0 : i32
    return %c0_i32, %c0_i32_0 : i32, i32
  }
  func.func @transform_3(%arg0: i32) -> (i32, i32) {
    %c0_i32 = arith.constant 0 : i32
    %c0_i32_0 = arith.constant 0 : i32
    %c0_i32_1 = arith.constant 0 : i32
    return %c0_i32, %c0_i32_0 : i32, i32
  }
  func.func @transform_4(%arg0: i32) -> (i32, i32, i32) {
    %c0_i32 = arith.constant 0 : i32
    %c0_i32_0 = arith.constant 0 : i32
    %c0_i32_1 = arith.constant 0 : i32
    return %arg0, %c0_i32, %c0_i32_0 : i32, i32, i32
  }
}

</mosaic_0001>

<bundles_post_ra>
// kernel: tpu_custom_call.1
= control target key start
LH: loop header
LB: loop body
LE: loop exit
PB: predicated region body
PF: predicated region fallthrough
CT: control target
= control target key end

     0   :  { %10 = vsyncpa [#allocation4], 0  ;;  %s309_s0 = inlined_call_operand.hbm [shape: f32[8,128], index: 0, kind: input, shape index: {}]   ;;  %s310_s1 = inlined_call_operand.hbm [shape: bf16[8,9], index: 1, kind: input, shape index: {}]   ;;  %s311_s2 = inlined_call_operand.vmem [shape: bf16[9,128], index: 2, kind: input, shape index: {}]   ;;  %s312_s3 = inlined_call_operand.<no memory space> [shape: f32[1,1], index: 3, kind: input, shape index: {}]   ;;  %s313_s4 = inlined_call_operand.hbm [shape: f32[1,8,128], index: 4, kind: output, shape index: {}]  }
   0x1   :  { %11 = vsyncpa [#allocation7], 0 }
   0x2   :  { %12 = vsyncpa [#allocation5], 0  ;;  %s236_s15 = smov [#allocation3]   ;;  %s237_s17 = smov [#allocation6]  }
   0x3   :  { %s19_s16 = sshll.u32 %s236_s15, 4  ;;  %s29_s18 = sshll.u32 %s237_s17, 4  ;;  %s20_s16 = int_to_ptr.vmem [resolvable:$true] %s19_s16  ;;  %s30_s18 = int_to_ptr.vmem [resolvable:$true] %s29_s18 }
   0x4   :  { %s164_s21 = scalar_lea.hbm %s309_s0, 128 }
   0x5   :  { %p165_p0 = scmp.ne.s32.totalorder %s309_s0, %s164_s21  ;;  %p168_p1 = scmp.lt.u32.totalorder %s164_s21, %s309_s0 }
   0x7   :  { %p170_p2 = pnand %p168_p1, %p165_p0 }
   0x9   :  { %173 = shalt.err (!%p170_p2)
}
   0xa   :  { %s174_s26 = scalar_lea.vmem %s20_s16, 128  ;;  %p179_p4 = scmp.lt.s32.totalorder %s20_s16, %s20_s16 }
   0xb   :  { %p175_p3 = scmp.ne.s32.totalorder %s20_s16, %s174_s26  ;;  %p180_p5 = scmp.lt.s32.totalorder %s174_s26, %s174_s26 }
   0xd   :  { %p181_p6 = por %p180_p5, %p179_p4 }
   0xf   :  { %p182_p7 = pnand %p181_p6, %p175_p3 }
  0x11   :  { %185 = shalt.err (!%p182_p7)
}
  0x12   :  { %22 = dma.hbm_to_vmem [thread:$0]  %s309_s0, 128, %s20_s16, [#allocation4]  }
  0x13   :  { %s186_s5 = scalar_lea.hbm %s310_s1, 64 }
  0x14   :  { %p187_p8 = scmp.ne.s32.totalorder %s310_s1, %s186_s5  ;;  %p190_p9 = scmp.lt.u32.totalorder %s186_s5, %s310_s1 }
  0x16   :  { %p192_p10 = pnand %p190_p9, %p187_p8 }
  0x18   :  { %195 = shalt.err (!%p192_p10)
}
  0x19   :  { %s196_s10 = scalar_lea.vmem %s30_s18, 64  ;;  %p201_p12 = scmp.lt.s32.totalorder %s30_s18, %s30_s18 }
  0x1a   :  { %p197_p11 = scmp.ne.s32.totalorder %s30_s18, %s196_s10  ;;  %p202_p13 = scmp.lt.s32.totalorder %s196_s10, %s196_s10 }
  0x1c   :  { %p203_p0 = por %p202_p13, %p201_p12 }
  0x1e   :  { %p204_p1 = pnand %p203_p0, %p197_p11 }
  0x20   :  { %207 = shalt.err (!%p204_p1)
}
  0x21   :  { %32 = dma.hbm_to_vmem [thread:$0]  %s310_s1, 64, %s30_s18, [#allocation7]  }
  0x22   :  { %230 = dma.done.wait [#allocation4], 128  }
  0x23   :  { %231 = vsyncadd [#allocation4], 4294967168 }
  0x24   :  { %232 = dma.done.wait [#allocation7], 64  }
  0x25   :  { %233 = vsyncadd [#allocation7], 4294967232  ;;  %vm57_vm0 = vcmask 1043456   ;;  %v238_v0 = vmov 0.0   ;;  %vm239_vm1 = vmmov 0   ;;  %vm58_vm2 = vcmask 1044480  }
  0x26   :  { %147 = vmatprep.subr.bf16.mxu0 %v238_v0  ;;  %149 = vmatprep.mubr.msk.bf16.mxu0 %vm239_vm1, %v238_v0  ;;  %v240_v1 = vmov 65535   ;;  %v159_v4 = vld [vmem:[%s311_s2] sm:$0x1f]   ;;  %v45_v6 = vld [vmem:[#allocation6] sm:$0xf]  ;;  %vm53_vm3 = vcmask 72704   ;;  %v114_v15 = vstv %s312_s3 }
  0x27   :  { %v59_v2 = vsel %vm57_vm0, 4294967295, %v240_v1  ;;  %v44_v7 = vld [vmem:[#allocation3] sm:$0xff]  ;;  %s241_s2 = smov [#allocation8]  }
  0x28   :  { %v60_v3 = vsel %vm58_vm2, %v59_v2, 0  ;;  %v107_v8 = vmul.f32 1.442695, %v44_v7  ;;  %v106_v13 = vmax.f32 %v44_v7, -100.0  ;;  %v115_v17 = vmul.f32 %v114_v15, %v44_v7  ;;  %s133_s15 = sshll.u32 %s241_s2, 4  ;;  %s134_s15 = int_to_ptr.vmem [resolvable:$true] %s133_s15 }
  0x29   :  { %v62_v5 = vand.u32 %v159_v4, %v60_v3  ;;  %s208_s3 = scalar_lea.vmem %s134_s15, 128  ;;  %p213_p3 = scmp.lt.s32.totalorder %s134_s15, %s134_s15 }
  0x2a   :  { %160 = vpow2.f32 %v107_v8  ;;  %p209_p2 = scmp.ne.s32.totalorder %s134_s15, %s208_s3  ;;  %p214_p4 = scmp.lt.s32.totalorder %s208_s3, %s208_s3 }
  0x2b   :  { %148 = vmatpush3.bf16.msra.mxu0 %v62_v5 }
  0x2c   :  { %p215_p5 = por %p214_p4, %p213_p3 }
  0x2e   :  { %150 = vmatmul.mubr.msk.bf16.vlgmr.msra.gmra.mrb[0].mxu0 %vm53_vm3, %v45_v6  ;;  %p216_p6 = pnand %p215_p5, %p209_p2 }
  0x34   :  { %v161_v9 = vpop.eup %160 }
  0x35   :  { %v109_v10 = vsub.f32 1.0, %v161_v9 }
  0x37   :  { %162 = vlog2.f32 %v109_v10 }
  0x41   :  { %v163_v11 = vpop.eup %162 }
  0x42   :  { %v111_v12 = vmul.f32 0.6931472, %v163_v11 }
  0x44   :  { %v112_v14 = vmax.f32 %v111_v12, -100.0 }
  0x46   :  { %v113_v16 = vsub.f32 %v106_v13, %v112_v14 }
  0x48   :  { %v116_v18 = vadd.f32 %v115_v17, %v113_v16 }
 0x101   :  { %v98_v19 = vpop.f32.mrb[0].mxu0 }
 0x102   :  { %vm104_vm4 = vcmp.eq.f32.partialorder %v98_v19, 0.0  ;;  %v151_v20 = vpop.f32.mrb[1].mxu0 }
 0x103   :  { %v117_v21 = vsel %vm104_vm4, %v116_v18, 0.0  ;;  %v101_v22 = vpop.f32.mrb[2].mxu0 }
 0x104   :  { %v118_v23 = vadd.f32 %v117_v21, %v112_v14  ;;  %v152_v24 = vpop.f32.mrb[3].mxu0 }
 0x106   :  { %v119_v25 = vrot.slane %v118_v23, 4 }
 0x108   :  { %v120_v26 = vadd.f32 %v119_v25, %v118_v23 }
 0x10a   :  { %v121_v27 = vrot.slane %v120_v26, 2 }
 0x10c   :  { %v122_v28 = vadd.f32 %v121_v27, %v120_v26 }
 0x10e   :  { %v123_v29 = vrot.slane %v122_v28, 1 }
 0x110   :  { %v124_v30 = vadd.f32 %v123_v29, %v122_v28 }
 0x112   :  { %v125_v31 = vsub.f32 0.0, %v124_v30 }
 0x114   :  { %126 = vst [vmem:[#allocation8] sm:$0xff] %v125_v31 }
 0x115   :  { %219 = shalt.err (!%p216_p6)
}
 0x116   :  { %s220_s18 = scalar_lea.hbm %s313_s4, 128 }
 0x117   :  { %p221_p7 = scmp.ne.s32.totalorder %s313_s4, %s220_s18  ;;  %p224_p8 = scmp.lt.u32.totalorder %s220_s18, %s313_s4 }
 0x119   :  { %p226_p9 = pnand %p224_p8, %p221_p7 }
 0x11b   :  { %229 = shalt.err (!%p226_p9)
}
 0x11c   :  { %136 = dma.vmem_to_hbm [thread:$0]  %s134_s15, 128, %s313_s4, [#allocation5]  }
 0x11d   :  { %234 = dma.done.wait [#allocation5], 128  }
 0x11e   :  { %235 = vsyncadd [#allocation5], 4294967168 }
 0x11f   :  { %140 = vsyncpa [#allocation4], 1 }
 0x120   :  { %141 = vsyncpa [#allocation7], 1 }
 0x121   :  { %142 = vsyncpa [#allocation5], 1 }

</bundles_post_ra>
